<compile_context>
chip_gen: v5e
topology: v5e:2x2
jax: 0.10.0
libtpu: 0.0.40
codegen_flags: <defaults>
</compile_context>

<pallas_src>
import functools

import jax
import jax.numpy as jnp
from jax.experimental import pallas as pl
from jax.experimental.pallas import tpu as pltpu


_VMEM_RESIDENT_BUDGET = 24 * 1024 * 1024  # conservative for v7x's 64 MiB VMEM


# ------------------------------ Pallas kernel ------------------------------ #
def _make_agg_kernel(*, apply_relu, tk, fw_resident, use_scratch):
    """Build the kernel for one grid step of out = [relu](A_hat @ FW + b)."""

    def kernel(a_ref, fw_ref, b_ref, out_ref, *scratch):
        # a_ref  : (TM, TK)       bf16  row/K tile of A_hat (streamed)
        # fw_ref : (N_pad, Fout)  bf16  VMEM-resident transformed features
        #          or (TK, Fout)        streamed K-slice (fallback)
        # b_ref  : (1, Fout)      f32   resident bias
        # out_ref: (TM, Fout)           resident across K (block index ignores k)
        # scratch: optional (TM, Fout) f32 accumulator (only when the output
        #          needs a relu / narrow-dtype finalize pass)
        acc_ref = scratch[0] if use_scratch else out_ref
        k = pl.program_id(1)

        @pl.when(k == 0)
        def _init():
            acc_ref[...] = jnp.zeros_like(acc_ref)

        if fw_resident:
            start = pl.multiple_of(k * tk, tk)
            fw = fw_ref[pl.ds(start, tk), :]
        else:
            fw = fw_ref[...]

        # Neighborhood aggregation on the MXU: bf16 inputs, f32 accumulation.
        acc_ref[...] += jnp.dot(a_ref[...], fw, preferred_element_type=jnp.float32)

        @pl.when(k == pl.num_programs(1) - 1)
        def _finalize():
            h = acc_ref[...] + b_ref[...]
            if apply_relu:
                h = jnp.maximum(h, 0.0)
            out_ref[...] = h.astype(out_ref.dtype)

    return kernel


def gcn_aggregate(a, fw, b, *, apply_relu, out_dtype, tm, tk):
    """out = [relu](a @ fw + b), with `a` streamed over a (rows, K) grid."""
    n_pad = a.shape[0]
    fout = fw.shape[1]
    grid = (n_pad // tm, n_pad // tk)

    out_dtype = jnp.dtype(out_dtype)
    use_scratch = apply_relu or out_dtype != jnp.float32

    fw_bytes = fw.size * fw.dtype.itemsize
    a_tile_bytes = tm * tk * a.dtype.itemsize
    # Keep FW VMEM-resident if (conservatively double-buffered) it plus the
    # double-buffered A tiles stay under the v7x-safe budget.
    fw_resident = (2 * fw_bytes + 2 * a_tile_bytes) <= _VMEM_RESIDENT_BUDGET

    if fw_resident:
        fw_spec = pl.BlockSpec((n_pad, fout), lambda i, k: (0, 0))
        fw_hbm_bytes = fw_bytes                     # fetched once
        fw_buf_bytes = 2 * fw_bytes                 # (conservative) 2x buffering
    else:
        fw_spec = pl.BlockSpec((tk, fout), lambda i, k: (k, 0))
        fw_hbm_bytes = grid[0] * fw_bytes           # re-streamed per row tile
        fw_buf_bytes = 2 * tk * fout * fw.dtype.itemsize

    kernel = _make_agg_kernel(
        apply_relu=apply_relu, tk=tk, fw_resident=fw_resident, use_scratch=use_scratch
    )
    scratch_shapes = [pltpu.VMEM((tm, fout), jnp.float32)] if use_scratch else []

    out_tile_bytes = tm * fout * out_dtype.itemsize
    working = (
        2 * a_tile_bytes                       # double-buffered A tile
        + fw_buf_bytes                         # FW buffers
        + 2 * out_tile_bytes                   # double-buffered out tile
        + (tm * fout * 4 if use_scratch else 0)  # f32 accumulator
        + 2 * fout * 4                         # bias
    )
    vmem_limit = int(min(max(2 * working, 32 << 20), 40 << 20))

    flops = 2 * n_pad * n_pad * fout
    bytes_accessed = (
        a.size * a.dtype.itemsize
        + fw_hbm_bytes
        + b.size * b.dtype.itemsize
        + n_pad * fout * out_dtype.itemsize
    )

    return pl.pallas_call(
        kernel,
        out_shape=jax.ShapeDtypeStruct((n_pad, fout), out_dtype),
        grid_spec=pltpu.PrefetchScalarGridSpec(
            num_scalar_prefetch=0,
            grid=grid,
            in_specs=[
                pl.BlockSpec((tm, tk), lambda i, k: (i, k)),     # A_hat tile
                fw_spec,                                         # transformed feats
                pl.BlockSpec((1, fout), lambda i, k: (0, 0)),    # resident bias
            ],
            out_specs=pl.BlockSpec((tm, fout), lambda i, k: (i, 0)),
            scratch_shapes=scratch_shapes,
        ),
        compiler_params=pltpu.CompilerParams(
            dimension_semantics=("parallel", "arbitrary"),
            vmem_limit_bytes=vmem_limit,
        ),
        cost_estimate=pl.CostEstimate(
            flops=flops, transcendentals=0, bytes_accessed=bytes_accessed
        ),
    )(a, fw, b)


# ------------------------------ JAX wrapper -------------------------------- #
def _round_up(x, m):
    return ((x + m - 1) // m) * m


def _pad2(x, shape):
    return jnp.pad(x, [(0, s - d) for s, d in zip(shape, x.shape)])


def choose_tiles(num_nodes):
    """Pick (n_pad, tm, tk): large tiles (>=256) for bandwidth / MXU fill, but
    keep >= 2 row tiles so the parallel row axis can shard across v7x's 2 TCs."""
    if num_nodes <= 256:
        n_pad = _round_up(num_nodes, 128)
        tm = 128 if n_pad >= 256 else n_pad
        tk = n_pad
    else:
        n_pad = _round_up(num_nodes, 512)
        tm = 256
        tk = 512
    return n_pad, tm, tk


def prepare_adjacency(a_hat, n_pad):
    """Pad + cast A_hat to bf16 ONCE; cache the result and reuse it across
    forward calls (avoids a full N^2 pad/cast pass per forward)."""
    return _pad2(a_hat, (n_pad, n_pad)).astype(jnp.bfloat16)


@functools.partial(jax.jit, static_argnames=("tm", "tk"))
def gcn_forward(a_p, x, w1, b1, w2, b2, *, tm, tk):
    """Two-layer GCN: out = A_hat @ (relu(A_hat @ (X W1) + b1) W2) + b2.

    a_p must be the pre-padded bf16 adjacency from prepare_adjacency.
    """
    n, _ = x.shape
    n_pad = a_p.shape[0]
    hid = w1.shape[1]
    cout = w2.shape[1]
    hid_p = _round_up(hid, 128)
    cout_p = _round_up(cout, 128)

    # Layer 1: feature transform hoisted out of the kernel (tiny matmul in XLA).
    fw1 = jnp.dot(x, w1, preferred_element_type=jnp.float32,
                  precision=jax.lax.Precision.HIGHEST)
    fw1 = _pad2(fw1, (n_pad, hid_p)).astype(jnp.bfloat16)
    b1_p = _pad2(b1.reshape(1, -1), (1, hid_p)).astype(jnp.float32)
    h1 = gcn_aggregate(a_p, fw1, b1_p, apply_relu=True,
                       out_dtype=jnp.bfloat16, tm=tm, tk=tk)       # [n_pad, hid_p]

    # Layer 2: transform hoisted as well; aggregate straight into the f32 output.
    w2_p = _pad2(w2, (hid_p, cout_p)).astype(jnp.bfloat16)
    fw2 = jnp.dot(h1, w2_p, preferred_element_type=jnp.float32).astype(jnp.bfloat16)
    b2_p = _pad2(b2.reshape(1, -1), (1, cout_p)).astype(jnp.float32)
    out = gcn_aggregate(a_p, fw2, b2_p, apply_relu=False,
                        out_dtype=jnp.float32, tm=tm, tk=tk)       # [n_pad, cout_p]
    return out[:n, :cout]


# TODO(synk): for large sparse graphs, replace dense A_hat streaming with a CSR
# gather-accumulate kernel (row_ptr/col_idx via scalar prefetch + manual
# double-buffered make_async_copy); dense streaming only makes sense for small
# or dense graphs.
def build_normalized_adjacency(edge_index, num_nodes):
    """Dense A_hat = D^{-1/2} (A + I) D^{-1/2} (PyG GCNConv default norm).

    Duplicate edges scatter-add (like PyG); self-loops are only added where the
    diagonal is still zero (add_remaining_self_loops semantics)."""
    src, dst = edge_index[0], edge_index[1]
    adj = jnp.zeros((num_nodes, num_nodes), jnp.float32).at[src, dst].add(1.0)
    diag = jnp.diagonal(adj)
    adj = adj + jnp.diag(jnp.where(diag == 0.0, 1.0, 0.0))
    deg = adj.sum(axis=1)
    deg_inv_sqrt = jnp.where(deg > 0, 1.0 / jnp.sqrt(deg), 0.0)
    return deg_inv_sqrt[:, None] * adj * deg_inv_sqrt[None, :]


def init_gcn_params(key, in_channels, hidden_channels, out_channels):
    """Glorot-style init; W [in, out], b [out] (GCNConv layout)."""
    k1, k2, k3, k4 = jax.random.split(key, 4)
    s1 = jnp.sqrt(6.0 / (in_channels + hidden_channels))
    s2 = jnp.sqrt(6.0 / (hidden_channels + out_channels))
    w1 = jax.random.uniform(k1, (in_channels, hidden_channels), jnp.float32, -s1, s1)
    w2 = jax.random.uniform(k2, (hidden_channels, out_channels), jnp.float32, -s2, s2)
    b1 = jax.random.uniform(k3, (hidden_channels,), jnp.float32, -0.1, 0.1)
    b2 = jax.random.uniform(k4, (out_channels,), jnp.float32, -0.1, 0.1)
    return w1, b1, w2, b2


if __name__ == "__main__":
    # Small deterministic synthetic graph consistent with the module:
    # features = ['total_up', 'total_down'] -> in_channels = 2.
    num_nodes = 200                  # pads to 256 -> grid (2, 1) row tiles
    in_channels, hidden_channels, out_channels = 2, 32, 4

    key = jax.random.PRNGKey(0)
    k_x, k_p = jax.random.split(key)

    # node features x: [N, in_channels]
    x = jax.random.normal(k_x, (num_nodes, in_channels), jnp.float32)

    # edge_index: bidirectional ring + skip-2 edges, shape [2, E] (deterministic).
    i = jnp.arange(num_nodes, dtype=jnp.int32)
    src = jnp.concatenate([i, (i + 1) % num_nodes, i, (i + 2) % num_nodes])
    dst = jnp.concatenate([(i + 1) % num_nodes, i, (i + 2) % num_nodes, i])
    edge_index = jnp.stack([src, dst], axis=0)

    a_hat = build_normalized_adjacency(edge_index, num_nodes)
    w1, b1, w2, b2 = init_gcn_params(k_p, in_channels, hidden_channels, out_channels)

    # Pad/cast the adjacency ONCE (would be cached across many forward calls).
    n_pad, tm, tk = choose_tiles(num_nodes)
    a_p = prepare_adjacency(a_hat, n_pad)
    jax.block_until_ready(a_p)

    out = gcn_forward(a_p, x, w1, b1, w2, b2, tm=tm, tk=tk)
    jax.block_until_ready(out)
    assert out.shape == (num_nodes, out_channels)

    # Pure-JAX f32 reference; tolerance loosened for bf16 streaming of A_hat/FW.
    h_ref = jnp.maximum(a_hat @ (x @ w1) + b1, 0.0)
    out_ref = a_hat @ (h_ref @ w2) + b2
    max_err = float(jnp.max(jnp.abs(out - out_ref)))
    assert jnp.allclose(out, out_ref, atol=5e-2, rtol=5e-2), max_err

    print("KERNEL_OK")
</pallas_src>

<mosaic_0001>
module attributes {stable_mosaic.version = 11 : i64} {
  func.func @kernel(%arg0: i32, %arg1: i32, %arg2: memref<128x256xbf16, #tpu.memory_space<vmem>>, %arg3: memref<256x128xbf16, #tpu.memory_space<vmem>>, %arg4: memref<1x128xf32, #tpu.memory_space<vmem>>, %arg5: memref<128x128xbf16, #tpu.memory_space<vmem>>, %arg6: memref<128x128xf32, #tpu.memory_space<vmem>>) attributes {dimension_semantics = [#tpu.dimension_semantics<parallel>, #tpu.dimension_semantics<arbitrary>], iteration_bounds = array<i64: 2, 1>, scalar_prefetch = 0 : i64, scratch_operands = 1 : i64, tpu.core_type = #tpu.core_type<tc>, window_params = [{transform_indices = @transform_0, window_bounds = array<i64: 128, 256>}, {pipeline_mode = #tpu.pipeline_mode<synchronous>, transform_indices = @transform_1, window_bounds = array<i64: 256, 128>}, {pipeline_mode = #tpu.pipeline_mode<synchronous>, transform_indices = @transform_2, window_bounds = array<i64: 1, 128>}, {transform_indices = @transform_3, window_bounds = array<i64: 128, 128>}]} {
    %c0_i32 = arith.constant 0 : i32
    %0 = arith.cmpi eq, %arg1, %c0_i32 : i32
    %1 = arith.extui %0 : i1 to i32
    %c0_i32_0 = arith.constant 0 : i32
    %2 = arith.cmpi ne, %1, %c0_i32_0 : i32
    scf.if %2 {
      %cst_9 = arith.constant 0.000000e+00 : f32
      %15 = vector.broadcast %cst_9 : f32 to vector<128x128xf32>
      %c0_10 = arith.constant 0 : index
      %c0_11 = arith.constant 0 : index
      %16 = vector.load %arg6[%c0_10, %c0_11] : memref<128x128xf32, #tpu.memory_space<vmem>>, vector<128x128xf32>
      tpu.vector_store %arg6[%c0_10, %c0_11], %15 {strides = array<i32>} : memref<128x128xf32, #tpu.memory_space<vmem>>, vector<128x128xf32>,
    } else {
    }
    %c256_i32 = arith.constant 256 : i32
    %3 = arith.muli %arg1, %c256_i32 : i32
    %4 = tpu.assume_multiple %3, 256 : i32
    %5 = arith.index_cast %4 : i32 to index
    %c0 = arith.constant 0 : index
    %6 = vector.load %arg3[%5, %c0] : memref<256x128xbf16, #tpu.memory_space<vmem>>, vector<256x128xbf16>
    %c0_1 = arith.constant 0 : index
    %c0_2 = arith.constant 0 : index
    %7 = vector.load %arg6[%c0_1, %c0_2] : memref<128x128xf32, #tpu.memory_space<vmem>>, vector<128x128xf32>
    %c0_3 = arith.constant 0 : index
    %c0_4 = arith.constant 0 : index
    %8 = vector.load %arg2[%c0_3, %c0_4] : memref<128x256xbf16, #tpu.memory_space<vmem>>, vector<128x256xbf16>
    %cst = arith.constant dense<0.000000e+00> : vector<128x128xf32>
    %9 = tpu.matmul %8, %6, %cst {dimension_numbers = #tpu.dot_dimension_numbers<[1], [0], [0], [1], [0, 0, 1, 1], [], []>} : vector<128x256xbf16>, vector<256x128xbf16>, vector<128x128xf32> -> vector<128x128xf32>
    %10 = arith.addf %7, %9 : vector<128x128xf32>
    %c0_5 = arith.constant 0 : index
    %c0_6 = arith.constant 0 : index
    %11 = vector.load %arg6[%c0_5, %c0_6] : memref<128x128xf32, #tpu.memory_space<vmem>>, vector<128x128xf32>
    tpu.vector_store %arg6[%c0_5, %c0_6], %10 {strides = array<i32>} : memref<128x128xf32, #tpu.memory_space<vmem>>, vector<128x128xf32>,
    %c0_i32_7 = arith.constant 0 : i32
    %12 = arith.cmpi eq, %arg1, %c0_i32_7 : i32
    %13 = arith.extui %12 : i1 to i32
    %c0_i32_8 = arith.constant 0 : i32
    %14 = arith.cmpi ne, %13, %c0_i32_8 : i32
    scf.if %14 {
      %c0_9 = arith.constant 0 : index
      %c0_10 = arith.constant 0 : index
      %15 = vector.load %arg6[%c0_9, %c0_10] : memref<128x128xf32, #tpu.memory_space<vmem>>, vector<128x128xf32>
      %c0_11 = arith.constant 0 : index
      %c0_12 = arith.constant 0 : index
      %16 = vector.load %arg4[%c0_11, %c0_12] : memref<1x128xf32, #tpu.memory_space<vmem>>, vector<1x128xf32>
      %17 = vector.broadcast %16 : vector<1x128xf32> to vector<128x128xf32>
      %18 = arith.addf %15, %17 : vector<128x128xf32>
      %cst_13 = arith.constant 0.000000e+00 : f32
      %19 = vector.broadcast %cst_13 : f32 to vector<128x128xf32>
      %20 = arith.maximumf %18, %19 : vector<128x128xf32>
      %21 = arith.truncf %20 : vector<128x128xf32> to vector<128x128xbf16>
      %c0_14 = arith.constant 0 : index
      %c0_15 = arith.constant 0 : index
      %22 = vector.load %arg5[%c0_14, %c0_15] : memref<128x128xbf16, #tpu.memory_space<vmem>>, vector<128x128xbf16>
      tpu.vector_store %arg5[%c0_14, %c0_15], %21 {strides = array<i32>} : memref<128x128xbf16, #tpu.memory_space<vmem>>, vector<128x128xbf16>,
    } else {
    }
    return
  }
  func.func @transform_0(%arg0: i32, %arg1: i32) -> (i32, i32) {
    %c0_i32 = arith.constant 0 : i32
    return %arg0, %arg1 : i32, i32
  }
  func.func @transform_1(%arg0: i32, %arg1: i32) -> (i32, i32) {
    %c0_i32 = arith.constant 0 : i32
    %c0_i32_0 = arith.constant 0 : i32
    %c0_i32_1 = arith.constant 0 : i32
    return %c0_i32, %c0_i32_0 : i32, i32
  }
  func.func @transform_2(%arg0: i32, %arg1: i32) -> (i32, i32) {
    %c0_i32 = arith.constant 0 : i32
    %c0_i32_0 = arith.constant 0 : i32
    %c0_i32_1 = arith.constant 0 : i32
    return %c0_i32, %c0_i32_0 : i32, i32
  }
  func.func @transform_3(%arg0: i32, %arg1: i32) -> (i32, i32) {
    %c0_i32 = arith.constant 0 : i32
    %c0_i32_0 = arith.constant 0 : i32
    return %arg0, %c0_i32 : i32, i32
  }
}

module attributes {stable_mosaic.version = 11 : i64} {
  func.func @kernel(%arg0: i32, %arg1: i32, %arg2: memref<128x256xbf16, #tpu.memory_space<vmem>>, %arg3: memref<256x128xbf16, #tpu.memory_space<vmem>>, %arg4: memref<1x128xf32, #tpu.memory_space<vmem>>, %arg5: memref<128x128xf32, #tpu.memory_space<vmem>>) attributes {dimension_semantics = [#tpu.dimension_semantics<parallel>, #tpu.dimension_semantics<arbitrary>], iteration_bounds = array<i64: 2, 1>, scalar_prefetch = 0 : i64, scratch_operands = 0 : i64, tpu.core_type = #tpu.core_type<tc>, window_params = [{transform_indices = @transform_0, window_bounds = array<i64: 128, 256>}, {pipeline_mode = #tpu.pipeline_mode<synchronous>, transform_indices = @transform_1, window_bounds = array<i64: 256, 128>}, {pipeline_mode = #tpu.pipeline_mode<synchronous>, transform_indices = @transform_2, window_bounds = array<i64: 1, 128>}, {transform_indices = @transform_3, window_bounds = array<i64: 128, 128>}]} {
    %c0_i32 = arith.constant 0 : i32
    %0 = arith.cmpi eq, %arg1, %c0_i32 : i32
    %1 = arith.extui %0 : i1 to i32
    %c0_i32_0 = arith.constant 0 : i32
    %2 = arith.cmpi ne, %1, %c0_i32_0 : i32
    scf.if %2 {
      %cst_9 = arith.constant 0.000000e+00 : f32
      %15 = vector.broadcast %cst_9 : f32 to vector<128x128xf32>
      %c0_10 = arith.constant 0 : index
      %c0_11 = arith.constant 0 : index
      %16 = vector.load %arg5[%c0_10, %c0_11] : memref<128x128xf32, #tpu.memory_space<vmem>>, vector<128x128xf32>
      tpu.vector_store %arg5[%c0_10, %c0_11], %15 {strides = array<i32>} : memref<128x128xf32, #tpu.memory_space<vmem>>, vector<128x128xf32>,
    } else {
    }
    %c256_i32 = arith.constant 256 : i32
    %3 = arith.muli %arg1, %c256_i32 : i32
    %4 = tpu.assume_multiple %3, 256 : i32
    %5 = arith.index_cast %4 : i32 to index
    %c0 = arith.constant 0 : index
    %6 = vector.load %arg3[%5, %c0] : memref<256x128xbf16, #tpu.memory_space<vmem>>, vector<256x128xbf16>
    %c0_1 = arith.constant 0 : index
    %c0_2 = arith.constant 0 : index
    %7 = vector.load %arg5[%c0_1, %c0_2] : memref<128x128xf32, #tpu.memory_space<vmem>>, vector<128x128xf32>
    %c0_3 = arith.constant 0 : index
    %c0_4 = arith.constant 0 : index
    %8 = vector.load %arg2[%c0_3, %c0_4] : memref<128x256xbf16, #tpu.memory_space<vmem>>, vector<128x256xbf16>
    %cst = arith.constant dense<0.000000e+00> : vector<128x128xf32>
    %9 = tpu.matmul %8, %6, %cst {dimension_numbers = #tpu.dot_dimension_numbers<[1], [0], [0], [1], [0, 0, 1, 1], [], []>} : vector<128x256xbf16>, vector<256x128xbf16>, vector<128x128xf32> -> vector<128x128xf32>
    %10 = arith.addf %7, %9 : vector<128x128xf32>
    %c0_5 = arith.constant 0 : index
    %c0_6 = arith.constant 0 : index
    %11 = vector.load %arg5[%c0_5, %c0_6] : memref<128x128xf32, #tpu.memory_space<vmem>>, vector<128x128xf32>
    tpu.vector_store %arg5[%c0_5, %c0_6], %10 {strides = array<i32>} : memref<128x128xf32, #tpu.memory_space<vmem>>, vector<128x128xf32>,
    %c0_i32_7 = arith.constant 0 : i32
    %12 = arith.cmpi eq, %arg1, %c0_i32_7 : i32
    %13 = arith.extui %12 : i1 to i32
    %c0_i32_8 = arith.constant 0 : i32
    %14 = arith.cmpi ne, %13, %c0_i32_8 : i32
    scf.if %14 {
      %c0_9 = arith.constant 0 : index
      %c0_10 = arith.constant 0 : index
      %15 = vector.load %arg5[%c0_9, %c0_10] : memref<128x128xf32, #tpu.memory_space<vmem>>, vector<128x128xf32>
      %c0_11 = arith.constant 0 : index
      %c0_12 = arith.constant 0 : index
      %16 = vector.load %arg4[%c0_11, %c0_12] : memref<1x128xf32, #tpu.memory_space<vmem>>, vector<1x128xf32>
      %17 = vector.broadcast %16 : vector<1x128xf32> to vector<128x128xf32>
      %18 = arith.addf %15, %17 : vector<128x128xf32>
      %c0_13 = arith.constant 0 : index
      %c0_14 = arith.constant 0 : index
      %19 = vector.load %arg5[%c0_13, %c0_14] : memref<128x128xf32, #tpu.memory_space<vmem>>, vector<128x128xf32>
      tpu.vector_store %arg5[%c0_13, %c0_14], %18 {strides = array<i32>} : memref<128x128xf32, #tpu.memory_space<vmem>>, vector<128x128xf32>,
    } else {
    }
    return
  }
  func.func @transform_0(%arg0: i32, %arg1: i32) -> (i32, i32) {
    %c0_i32 = arith.constant 0 : i32
    return %arg0, %arg1 : i32, i32
  }
  func.func @transform_1(%arg0: i32, %arg1: i32) -> (i32, i32) {
    %c0_i32 = arith.constant 0 : i32
    %c0_i32_0 = arith.constant 0 : i32
    %c0_i32_1 = arith.constant 0 : i32
    return %c0_i32, %c0_i32_0 : i32, i32
  }
  func.func @transform_2(%arg0: i32, %arg1: i32) -> (i32, i32) {
    %c0_i32 = arith.constant 0 : i32
    %c0_i32_0 = arith.constant 0 : i32
    %c0_i32_1 = arith.constant 0 : i32
    return %c0_i32, %c0_i32_0 : i32, i32
  }
  func.func @transform_3(%arg0: i32, %arg1: i32) -> (i32, i32) {
    %c0_i32 = arith.constant 0 : i32
    %c0_i32_0 = arith.constant 0 : i32
    return %arg0, %c0_i32 : i32, i32
  }
}

</mosaic_0001>

<bundles_post_ra>
// kernel: gcn_forward.3
= control target key start
LH: loop header
LB: loop body
LE: loop exit
PB: predicated region body
PF: predicated region fallthrough
CT: control target
= control target key end

     0   :  { %s987_s12 = smov 0   ;;  %s989_s13 = smov 0   ;;  %s1151_s0 = inlined_call_operand.vmem [shape: bf16[256,256], index: 0, kind: input, shape index: {}]   ;;  %s1152_s1 = inlined_call_operand.vmem [shape: bf16[256,128], index: 1, kind: input, shape index: {}]   ;;  %s1153_s2 = inlined_call_operand.vmem [shape: f32[1,128], index: 2, kind: input, shape index: {}]   ;;  %s1154_s3 = inlined_call_operand.vmem [shape: f32[256,128], index: 3, kind: output, shape index: {}]  }
   0x1   :  { %s991_s14 = smov 0  }
   0x2 LB: > { %s25_s15 = sadd.s32 1, %s961_s13  ;;  %p732_p0 = scmp.ge.s32.totalorder %s965_s14, 1  ;;  %s965_s14 = sphi %s991_s14, %s13_s14   ;;  %s961_s13 = sphi %s989_s13, %s1156_s13   ;;  %s957_s12 = sphi %s987_s12, %s1155_s12  }
   0x3   : > { %p27_p1 = scmp.ge.s32.totalorder %s25_s15, 2  ;;  %p158_p2 = scmp.lt.s32.totalorder %s965_s14, 3 }
   0x5   : > { %s1158_s15 = smov (%p27_p1, %s25_s15), 0  ;;  %p159_p3 = pnand %p732_p0, %p158_p2 }
   0x6   : > { %s733_s28 = sshll.u32 (!%p159_p3), %s957_s12, 4 }
   0x7   : > { %162 = sbr.rel (%p159_p3) target bundleno = 238 (0xee), region = 32  ;;  %p189_p4 = scmp.lt.s32.totalorder (!%p159_p3), %s733_s28, 31 }
   0xc   : > { %v876_v0 = vld [vmem:[%s1152_s1 + $0x38] sm:$0xff]  ;;  %v875_v2 = vld [vmem:[%s1152_s1 + $0x30] sm:$0xff]  ;;  %v874_v4 = vld [vmem:[%s1152_s1 + $0x28] sm:$0xff]  ;;  %s1160_s28 = smov (!%p189_p4, %s733_s28), 31 }
   0xd   : > { %v884_v1 = vld [vmem:[%s1152_s1 + $0x78] sm:$0xff]  ;;  %470 = vmatpush.bf16.msra.mxu0 %v876_v0  ;;  %901 = vmatpush.bf16.msra.mxu2 %v876_v0  ;;  %v883_v3 = vld [vmem:[%s1152_s1 + $0x70] sm:$0xff]  ;;  %v882_v5 = vld [vmem:[%s1152_s1 + $0x68] sm:$0xff]  ;;  %s868_s17 = sshll.u32 %s1160_s28, 3 }
   0xe   : > { %519 = vmatpush.bf16.msra.mxu1 %v884_v1  ;;  %909 = vmatpush.bf16.msra.mxu3 %v884_v1  ;;  %v873_v6 = vld [vmem:[%s1152_s1 + $0x20] sm:$0xff]  ;;  %v872_v8 = vld [vmem:[%s1152_s1 + $0x18] sm:$0xff]  ;;  %v871_v10 = vld [vmem:[%s1152_s1 + $0x10] sm:$0xff]  ;;  %s1055_s22 = scalar_lea.vmem %s1151_s0, %s868_s17  ;;  %s1108_s7 = scalar_lea.vmem %s1154_s3, %s868_s17 }
   0xf   : > { %v881_v7 = vld [vmem:[%s1152_s1 + $0x60] sm:$0xff]  ;;  %v880_v9 = vld [vmem:[%s1152_s1 + $0x58] sm:$0xff]  ;;  %v879_v11 = vld [vmem:[%s1152_s1 + $0x50] sm:$0xff] }
  0x10   : > { %v870_v12 = vld [vmem:[%s1152_s1 + $0x8] sm:$0xff]  ;;  %v869_v14 = vld [vmem:[%s1152_s1] sm:$0xff]  ;;  %v748_v28 = vld [vmem:[%s1055_s22 + $0x10] sm:$0xf] }
  0x11   : > { %471 = vmatpush.bf16.msra.mxu0 %v875_v2  ;;  %902 = vmatpush.bf16.msra.mxu2 %v875_v2  ;;  %v878_v13 = vld [vmem:[%s1152_s1 + $0x48] sm:$0xff]  ;;  %v877_v15 = vld [vmem:[%s1152_s1 + $0x40] sm:$0xff]  ;;  %v888_v29 = vld [vmem:[%s1055_s22 + $0x14] sm:$0xf0] }
  0x12   : > { %520 = vmatpush.bf16.msra.mxu1 %v883_v3  ;;  %910 = vmatpush.bf16.msra.mxu3 %v883_v3  ;;  %v740_v16 = vld [vmem:[%s1055_s22] sm:$0xf]  ;;  %v886_v17 = vld [vmem:[%s1055_s22 + $0x4] sm:$0xf0]  ;;  %v885_v20 = vld [vmem:[%s1055_s22 + $0x4] sm:$0xf]  ;;  %v749_v36 = vor.u32 %v888_v29, %v748_v28 }
  0x13   : > { %v772_v18 = vld [vmem:[%s1055_s22 + $0x40] sm:$0xf]  ;;  %v894_v19 = vld [vmem:[%s1055_s22 + $0x44] sm:$0xf0]  ;;  %v742_v21 = vld [vmem:[%s1055_s22 + $0x8] sm:$0xf0]  ;;  %v741_v24 = vor.u32 %v886_v17, %v740_v16 }
  0x14   : > { %v893_v22 = vld [vmem:[%s1055_s22 + $0x44] sm:$0xf]  ;;  %v774_v23 = vld [vmem:[%s1055_s22 + $0x48] sm:$0xf0]  ;;  %v773_v25 = vor.u32 %v894_v19, %v772_v18  ;;  %v745_v26 = vor.u32 %v885_v20, %v742_v21  ;;  %v780_v30 = vld [vmem:[%s1055_s22 + $0x50] sm:$0xf] }
  0x15   : > { %472 = vmatpush.bf16.msra.mxu0 %v874_v4  ;;  %903 = vmatpush.bf16.msra.mxu2 %v874_v4  ;;  %v777_v27 = vor.u32 %v893_v22, %v774_v23  ;;  %v896_v31 = vld [vmem:[%s1055_s22 + $0x54] sm:$0xf0]  ;;  %v887_v32 = vld [vmem:[%s1055_s22 + $0x14] sm:$0xf]  ;;  %v750_v33 = vld [vmem:[%s1055_s22 + $0x18] sm:$0xf0] }
  0x16   : > { %521 = vmatpush.bf16.msra.mxu1 %v882_v5  ;;  %911 = vmatpush.bf16.msra.mxu3 %v882_v5  ;;  %v895_v34 = vld [vmem:[%s1055_s22 + $0x54] sm:$0xf]  ;;  %v782_v35 = vld [vmem:[%s1055_s22 + $0x58] sm:$0xf0]  ;;  %v781_v37 = vor.u32 %v896_v31, %v780_v30  ;;  %v753_v38 = vor.u32 %v887_v32, %v750_v33  ;;  %v756_v40 = vld [vmem:[%s1055_s22 + $0x20] sm:$0xf] }
  0x17   : > { %v785_v39 = vor.u32 %v895_v34, %v782_v35  ;;  %v890_v41 = vld [vmem:[%s1055_s22 + $0x24] sm:$0xf0]  ;;  %v788_v42 = vld [vmem:[%s1055_s22 + $0x60] sm:$0xf]  ;;  %v889_v44 = vld [vmem:[%s1055_s22 + $0x24] sm:$0xf] }
  0x18   : > { %v898_v43 = vld [vmem:[%s1055_s22 + $0x64] sm:$0xf0]  ;;  %v758_v45 = vld [vmem:[%s1055_s22 + $0x28] sm:$0xf0]  ;;  %v897_v46 = vld [vmem:[%s1055_s22 + $0x64] sm:$0xf]  ;;  %v757_v48 = vor.u32 %v890_v41, %v756_v40 }
  0x19   : > { %473 = vmatpush.bf16.msra.mxu0 %v873_v6  ;;  %904 = vmatpush.bf16.msra.mxu2 %v873_v6  ;;  %v790_v47 = vld [vmem:[%s1055_s22 + $0x68] sm:$0xf0]  ;;  %v789_v49 = vor.u32 %v898_v43, %v788_v42  ;;  %v761_v50 = vor.u32 %v889_v44, %v758_v45  ;;  %v764_v52 = vld [vmem:[%s1055_s22 + $0x30] sm:$0xf]  ;;  %v892_v53 = vld [vmem:[%s1055_s22 + $0x34] sm:$0xf0] }
  0x1a   : > { %522 = vmatpush.bf16.msra.mxu1 %v881_v7  ;;  %912 = vmatpush.bf16.msra.mxu3 %v881_v7  ;;  %v793_v51 = vor.u32 %v897_v46, %v790_v47  ;;  %v796_v54 = vld [vmem:[%s1055_s22 + $0x70] sm:$0xf]  ;;  %v900_v55 = vld [vmem:[%s1055_s22 + $0x74] sm:$0xf0]  ;;  %v891_v56 = vld [vmem:[%s1055_s22 + $0x34] sm:$0xf]  ;;  %v765_v60 = vor.u32 %v892_v53, %v764_v52 }
  0x1b   : > { %v766_v57 = vld [vmem:[%s1055_s22 + $0x38] sm:$0xf0]  ;;  %v899_v58 = vld [vmem:[%s1055_s22 + $0x74] sm:$0xf]  ;;  %v797_v61 = vor.u32 %v900_v55, %v796_v54  ;;  %v1101_v3 = vld [vmem:[%s1153_s2] ss:$0 sm:$0xff] }
  0x1c   : > { %v798_v59 = vld [vmem:[%s1055_s22 + $0x78] sm:$0xf0]  ;;  %v769_v62 = vor.u32 %v891_v56, %v766_v57 }
  0x1d   : > { %474 = vmatpush.bf16.msra.mxu0 %v872_v8  ;;  %905 = vmatpush.bf16.msra.mxu2 %v872_v8  ;;  %v801_v63 = vor.u32 %v899_v58, %v798_v59 }
  0x1e   : > { %523 = vmatpush.bf16.msra.mxu1 %v880_v9  ;;  %913 = vmatpush.bf16.msra.mxu3 %v880_v9 }
  0x21   : > { %475 = vmatpush.bf16.msra.mxu0 %v871_v10  ;;  %906 = vmatpush.bf16.msra.mxu2 %v871_v10 }
  0x22   : > { %524 = vmatpush.bf16.msra.mxu1 %v879_v11  ;;  %914 = vmatpush.bf16.msra.mxu3 %v879_v11 }
  0x25   : > { %476 = vmatpush.bf16.msra.mxu0 %v870_v12  ;;  %907 = vmatpush.bf16.msra.mxu2 %v870_v12 }
  0x26   : > { %525 = vmatpush.bf16.msra.mxu1 %v878_v13  ;;  %915 = vmatpush.bf16.msra.mxu3 %v878_v13 }
  0x29   : > { %477 = vmatpush.bf16.msra.mxu0 %v869_v14  ;;  %908 = vmatpush.bf16.msra.mxu2 %v869_v14 }
  0x2a   : > { %526 = vmatpush.bf16.msra.mxu1 %v877_v15  ;;  %916 = vmatpush.bf16.msra.mxu3 %v877_v15 }
  0x2c   : > { %478 = vmatmul.bf16.vlgmr.msra.gmra.mxu0 %v741_v24  ;;  %498 = vmatmul.bf16.vlgmr.msra.gmra.mxu2 %v773_v25 }
  0x2d   : > { %527 = vmatmul.bf16.vlgmr.msra.gmra.mxu1 %v745_v26  ;;  %547 = vmatmul.bf16.vlgmr.msra.gmra.mxu3 %v777_v27 }
  0x3c   : > { %483 = vmatmul.bf16.gmra.mxu0 %v749_v36  ;;  %503 = vmatmul.bf16.gmra.mxu2 %v781_v37 }
  0x3d   : > { %532 = vmatmul.bf16.gmra.mxu1 %v753_v38  ;;  %552 = vmatmul.bf16.gmra.mxu3 %v785_v39 }
  0x4c   : > { %488 = vmatmul.bf16.gmra.mxu0 %v757_v48  ;;  %508 = vmatmul.bf16.gmra.mxu2 %v789_v49 }
  0x4d   : > { %537 = vmatmul.bf16.gmra.mxu1 %v761_v50  ;;  %557 = vmatmul.bf16.gmra.mxu3 %v793_v51 }
  0x5c   : > { %493 = vmatmul.bf16.gmra.mxu0 %v765_v60  ;;  %513 = vmatmul.bf16.gmra.mxu2 %v797_v61 }
  0x5d   : > { %542 = vmatmul.bf16.gmra.mxu1 %v769_v62  ;;  %562 = vmatmul.bf16.gmra.mxu3 %v801_v63 }
  0xa9   : > { %v479_v0 = vpop.f32.mrf.mxu0 }
  0xaa   : > { %v528_v1 = vpop.f32.mrf.mxu1 }
  0xab   : > { %v529_v2 = vadd.f32 %v528_v1, %v479_v0 }
  0xad   : > { %v623_v4 = vadd.f32 %v1101_v3, %v529_v2 }
  0xaf   : > { %v499_v5 = vpop.f32.mrf.mxu2  ;;  %639 = vst [vmem:[%s1108_s7] sm:$0xff] %v623_v4 }
  0xb0   : > { %v548_v6 = vpop.f32.mrf.mxu3 }
  0xb1   : > { %v549_v7 = vadd.f32 %v548_v6, %v499_v5  ;;  %v481_v8 = vpop.f32.mrf.mxu0 }
  0xb2   : > { %v530_v9 = vpop.f32.mrf.mxu1 }
  0xb3   : > { %v531_v10 = vadd.f32 %v530_v9, %v481_v8  ;;  %v631_v11 = vadd.f32 %v1101_v3, %v549_v7 }
  0xb5   : > { %647 = vst [vmem:[%s1108_s7 + $0x40] sm:$0xff] %v631_v11  ;;  %v624_v12 = vadd.f32 %v1101_v3, %v531_v10 }
  0xb7   : > { %v501_v13 = vpop.f32.mrf.mxu2  ;;  %640 = vst [vmem:[%s1108_s7 + $0x8] sm:$0xff] %v624_v12 }
  0xb8   : > { %v550_v14 = vpop.f32.mrf.mxu3 }
  0xb9   : > { %v551_v15 = vadd.f32 %v550_v14, %v501_v13  ;;  %v484_v16 = vpop.f32.mrf.mxu0 }
  0xba   : > { %v533_v17 = vpop.f32.mrf.mxu1 }
  0xbb   : > { %v534_v18 = vadd.f32 %v533_v17, %v484_v16  ;;  %v632_v19 = vadd.f32 %v1101_v3, %v551_v15 }
  0xbd   : > { %648 = vst [vmem:[%s1108_s7 + $0x48] sm:$0xff] %v632_v19  ;;  %v625_v20 = vadd.f32 %v1101_v3, %v534_v18 }
  0xbf   : > { %v504_v21 = vpop.f32.mrf.mxu2  ;;  %641 = vst [vmem:[%s1108_s7 + $0x10] sm:$0xff] %v625_v20 }
  0xc0   : > { %v553_v22 = vpop.f32.mrf.mxu3 }
  0xc1   : > { %v554_v23 = vadd.f32 %v553_v22, %v504_v21  ;;  %v486_v24 = vpop.f32.mrf.mxu0 }
  0xc2   : > { %v535_v25 = vpop.f32.mrf.mxu1 }
  0xc3   : > { %v536_v26 = vadd.f32 %v535_v25, %v486_v24  ;;  %v633_v27 = vadd.f32 %v1101_v3, %v554_v23 }
  0xc5   : > { %649 = vst [vmem:[%s1108_s7 + $0x50] sm:$0xff] %v633_v27  ;;  %v626_v28 = vadd.f32 %v1101_v3, %v536_v26 }
  0xc7   : > { %v506_v29 = vpop.f32.mrf.mxu2  ;;  %642 = vst [vmem:[%s1108_s7 + $0x18] sm:$0xff] %v626_v28 }
  0xc8   : > { %v555_v30 = vpop.f32.mrf.mxu3 }
  0xc9   : > { %v556_v31 = vadd.f32 %v555_v30, %v506_v29  ;;  %v489_v32 = vpop.f32.mrf.mxu0 }
  0xca   : > { %v538_v33 = vpop.f32.mrf.mxu1 }
  0xcb   : > { %v539_v34 = vadd.f32 %v538_v33, %v489_v32  ;;  %v634_v35 = vadd.f32 %v1101_v3, %v556_v31 }
  0xcd   : > { %650 = vst [vmem:[%s1108_s7 + $0x58] sm:$0xff] %v634_v35  ;;  %v627_v36 = vadd.f32 %v1101_v3, %v539_v34 }
  0xcf   : > { %v509_v37 = vpop.f32.mrf.mxu2  ;;  %643 = vst [vmem:[%s1108_s7 + $0x20] sm:$0xff] %v627_v36 }
  0xd0   : > { %v558_v38 = vpop.f32.mrf.mxu3 }
  0xd1   : > { %v559_v39 = vadd.f32 %v558_v38, %v509_v37  ;;  %v491_v40 = vpop.f32.mrf.mxu0 }
  0xd2   : > { %v540_v41 = vpop.f32.mrf.mxu1 }
  0xd3   : > { %v541_v42 = vadd.f32 %v540_v41, %v491_v40  ;;  %v635_v43 = vadd.f32 %v1101_v3, %v559_v39 }
  0xd5   : > { %651 = vst [vmem:[%s1108_s7 + $0x60] sm:$0xff] %v635_v43  ;;  %v628_v44 = vadd.f32 %v1101_v3, %v541_v42 }
  0xd7   : > { %v511_v45 = vpop.f32.mrf.mxu2  ;;  %644 = vst [vmem:[%s1108_s7 + $0x28] sm:$0xff] %v628_v44 }
  0xd8   : > { %v560_v46 = vpop.f32.mrf.mxu3 }
  0xd9   : > { %v561_v47 = vadd.f32 %v560_v46, %v511_v45  ;;  %v494_v48 = vpop.f32.mrf.mxu0 }
  0xda   : > { %v543_v49 = vpop.f32.mrf.mxu1 }
  0xdb   : > { %v544_v50 = vadd.f32 %v543_v49, %v494_v48  ;;  %v636_v51 = vadd.f32 %v1101_v3, %v561_v47 }
  0xdd   : > { %652 = vst [vmem:[%s1108_s7 + $0x68] sm:$0xff] %v636_v51  ;;  %v629_v52 = vadd.f32 %v1101_v3, %v544_v50 }
  0xdf   : > { %v514_v53 = vpop.f32.mrf.mxu2  ;;  %645 = vst [vmem:[%s1108_s7 + $0x30] sm:$0xff] %v629_v52 }
  0xe0   : > { %v563_v54 = vpop.f32.mrf.mxu3 }
  0xe1   : > { %v564_v55 = vadd.f32 %v563_v54, %v514_v53  ;;  %v496_v56 = vpop.f32.mrf.mxu0 }
  0xe2   : > { %v545_v57 = vpop.f32.mrf.mxu1 }
  0xe3   : > { %v546_v58 = vadd.f32 %v545_v57, %v496_v56  ;;  %v637_v59 = vadd.f32 %v1101_v3, %v564_v55 }
  0xe5   : > { %653 = vst [vmem:[%s1108_s7 + $0x70] sm:$0xff] %v637_v59  ;;  %v630_v60 = vadd.f32 %v1101_v3, %v546_v58 }
  0xe7   : > { %v516_v61 = vpop.f32.mrf.mxu2  ;;  %646 = vst [vmem:[%s1108_s7 + $0x38] sm:$0xff] %v630_v60 }
  0xe8   : > { %v565_v62 = vpop.f32.mrf.mxu3 }
  0xe9   : > { %v566_v63 = vadd.f32 %v565_v62, %v516_v61 }
  0xeb   : > { %v638_v0 = vadd.f32 %v1101_v3, %v566_v63 }
  0xed   : > { %654 = vst [vmem:[%s1108_s7 + $0x78] sm:$0xff] %v638_v0 }
  0xee PF: > { %s13_s14 = sadd.s32 1, %s965_s14   ;;  %s1155_s12 = smov %s961_s13 }
  0xef   : > { %p10_p5 = scmp.ge.s32.totalorder %s13_s14, 4   ;;  %s1156_s13 = smov %s1158_s15 }
  0xf1   :  { %12 = sbr.rel (!%p10_p5) target bundleno = 2 (0x2), region = 71 }

// kernel: gcn_forward.2
= control target key start
LH: loop header
LB: loop body
LE: loop exit
PB: predicated region body
PF: predicated region fallthrough
CT: control target
= control target key end

     0   :  { %s1065_s12 = smov 0   ;;  %s1067_s13 = smov 0   ;;  %s1218_s0 = inlined_call_operand.vmem [shape: bf16[256,256], index: 0, kind: input, shape index: {}]   ;;  %s1219_s1 = inlined_call_operand.vmem [shape: bf16[256,128], index: 1, kind: input, shape index: {}]   ;;  %s1220_s2 = inlined_call_operand.vmem [shape: f32[1,128], index: 2, kind: input, shape index: {}]   ;;  %s1221_s3 = inlined_call_operand.vmem [shape: bf16[256,128], index: 3, kind: output, shape index: {}]  }
   0x1   :  { %s1069_s14 = smov 0  }
   0x2 LB: > { %s25_s15 = sadd.s32 1, %s1039_s13  ;;  %p764_p0 = scmp.ge.s32.totalorder %s1043_s14, 1  ;;  %s1043_s14 = sphi %s1069_s14, %s13_s14   ;;  %s1039_s13 = sphi %s1067_s13, %s1223_s13   ;;  %s1035_s12 = sphi %s1065_s12, %s1222_s12  }
   0x3   : > { %p27_p1 = scmp.ge.s32.totalorder %s25_s15, 2  ;;  %p158_p2 = scmp.lt.s32.totalorder %s1043_s14, 3 }
   0x5   : > { %s1225_s15 = smov (%p27_p1, %s25_s15), 0  ;;  %p159_p3 = pnand %p764_p0, %p158_p2 }
   0x6   : > { %s765_s28 = sshll.u32 (!%p159_p3), %s1035_s12, 4 }
   0x7   : > { %162 = sbr.rel (%p159_p3) target bundleno = 242 (0xf2), region = 32  ;;  %p189_p4 = scmp.lt.s32.totalorder (!%p159_p3), %s765_s28, 31 }
   0xc   : > { %v908_v0 = vld [vmem:[%s1219_s1 + $0x38] sm:$0xff]  ;;  %v907_v2 = vld [vmem:[%s1219_s1 + $0x30] sm:$0xff]  ;;  %v906_v4 = vld [vmem:[%s1219_s1 + $0x28] sm:$0xff]  ;;  %s1227_s28 = smov (!%p189_p4, %s765_s28), 31 }
   0xd   : > { %v916_v1 = vld [vmem:[%s1219_s1 + $0x78] sm:$0xff]  ;;  %470 = vmatpush.bf16.msra.mxu0 %v908_v0  ;;  %980 = vmatpush.bf16.msra.mxu2 %v908_v0  ;;  %v915_v3 = vld [vmem:[%s1219_s1 + $0x70] sm:$0xff]  ;;  %v914_v5 = vld [vmem:[%s1219_s1 + $0x68] sm:$0xff]  ;;  %s900_s17 = sshll.u32 %s1227_s28, 3  ;;  %s769_s5 = sshll.u32 %s1227_s28, 2 }
   0xe   : > { %519 = vmatpush.bf16.msra.mxu1 %v916_v1  ;;  %988 = vmatpush.bf16.msra.mxu3 %v916_v1  ;;  %v905_v6 = vld [vmem:[%s1219_s1 + $0x20] sm:$0xff]  ;;  %v904_v8 = vld [vmem:[%s1219_s1 + $0x18] sm:$0xff]  ;;  %v903_v10 = vld [vmem:[%s1219_s1 + $0x10] sm:$0xff]  ;;  %s1131_s22 = scalar_lea.vmem %s1218_s0, %s900_s17  ;;  %s1185_s8 = scalar_lea.vmem %s1221_s3, %s769_s5 }
   0xf   : > { %v913_v7 = vld [vmem:[%s1219_s1 + $0x60] sm:$0xff]  ;;  %v912_v9 = vld [vmem:[%s1219_s1 + $0x58] sm:$0xff]  ;;  %v911_v11 = vld [vmem:[%s1219_s1 + $0x50] sm:$0xff] }
  0x10   : > { %v902_v12 = vld [vmem:[%s1219_s1 + $0x8] sm:$0xff]  ;;  %v901_v14 = vld [vmem:[%s1219_s1] sm:$0xff]  ;;  %v780_v28 = vld [vmem:[%s1131_s22 + $0x10] sm:$0xf] }
  0x11   : > { %471 = vmatpush.bf16.msra.mxu0 %v907_v2  ;;  %981 = vmatpush.bf16.msra.mxu2 %v907_v2  ;;  %v910_v13 = vld [vmem:[%s1219_s1 + $0x48] sm:$0xff]  ;;  %v909_v15 = vld [vmem:[%s1219_s1 + $0x40] sm:$0xff]  ;;  %v920_v29 = vld [vmem:[%s1131_s22 + $0x14] sm:$0xf0] }
  0x12   : > { %520 = vmatpush.bf16.msra.mxu1 %v915_v3  ;;  %989 = vmatpush.bf16.msra.mxu3 %v915_v3  ;;  %v772_v16 = vld [vmem:[%s1131_s22] sm:$0xf]  ;;  %v918_v17 = vld [vmem:[%s1131_s22 + $0x4] sm:$0xf0]  ;;  %v917_v20 = vld [vmem:[%s1131_s22 + $0x4] sm:$0xf]  ;;  %v781_v36 = vor.u32 %v920_v29, %v780_v28 }
  0x13   : > { %v804_v18 = vld [vmem:[%s1131_s22 + $0x40] sm:$0xf]  ;;  %v926_v19 = vld [vmem:[%s1131_s22 + $0x44] sm:$0xf0]  ;;  %v774_v21 = vld [vmem:[%s1131_s22 + $0x8] sm:$0xf0]  ;;  %v773_v24 = vor.u32 %v918_v17, %v772_v16 }
  0x14   : > { %v925_v22 = vld [vmem:[%s1131_s22 + $0x44] sm:$0xf]  ;;  %v806_v23 = vld [vmem:[%s1131_s22 + $0x48] sm:$0xf0]  ;;  %v805_v25 = vor.u32 %v926_v19, %v804_v18  ;;  %v777_v26 = vor.u32 %v917_v20, %v774_v21  ;;  %v812_v30 = vld [vmem:[%s1131_s22 + $0x50] sm:$0xf] }
  0x15   : > { %472 = vmatpush.bf16.msra.mxu0 %v906_v4  ;;  %982 = vmatpush.bf16.msra.mxu2 %v906_v4  ;;  %v809_v27 = vor.u32 %v925_v22, %v806_v23  ;;  %v928_v31 = vld [vmem:[%s1131_s22 + $0x54] sm:$0xf0]  ;;  %v919_v32 = vld [vmem:[%s1131_s22 + $0x14] sm:$0xf]  ;;  %v782_v33 = vld [vmem:[%s1131_s22 + $0x18] sm:$0xf0] }
  0x16   : > { %521 = vmatpush.bf16.msra.mxu1 %v914_v5  ;;  %990 = vmatpush.bf16.msra.mxu3 %v914_v5  ;;  %v927_v34 = vld [vmem:[%s1131_s22 + $0x54] sm:$0xf]  ;;  %v814_v35 = vld [vmem:[%s1131_s22 + $0x58] sm:$0xf0]  ;;  %v813_v37 = vor.u32 %v928_v31, %v812_v30  ;;  %v785_v38 = vor.u32 %v919_v32, %v782_v33  ;;  %v788_v40 = vld [vmem:[%s1131_s22 + $0x20] sm:$0xf] }
  0x17   : > { %v817_v39 = vor.u32 %v927_v34, %v814_v35  ;;  %v922_v41 = vld [vmem:[%s1131_s22 + $0x24] sm:$0xf0]  ;;  %v820_v42 = vld [vmem:[%s1131_s22 + $0x60] sm:$0xf]  ;;  %v921_v44 = vld [vmem:[%s1131_s22 + $0x24] sm:$0xf] }
  0x18   : > { %v930_v43 = vld [vmem:[%s1131_s22 + $0x64] sm:$0xf0]  ;;  %v790_v45 = vld [vmem:[%s1131_s22 + $0x28] sm:$0xf0]  ;;  %v929_v46 = vld [vmem:[%s1131_s22 + $0x64] sm:$0xf]  ;;  %v789_v48 = vor.u32 %v922_v41, %v788_v40 }
  0x19   : > { %473 = vmatpush.bf16.msra.mxu0 %v905_v6  ;;  %983 = vmatpush.bf16.msra.mxu2 %v905_v6  ;;  %v822_v47 = vld [vmem:[%s1131_s22 + $0x68] sm:$0xf0]  ;;  %v821_v49 = vor.u32 %v930_v43, %v820_v42  ;;  %v793_v50 = vor.u32 %v921_v44, %v790_v45  ;;  %v796_v52 = vld [vmem:[%s1131_s22 + $0x30] sm:$0xf]  ;;  %v924_v53 = vld [vmem:[%s1131_s22 + $0x34] sm:$0xf0] }
  0x1a   : > { %522 = vmatpush.bf16.msra.mxu1 %v913_v7  ;;  %991 = vmatpush.bf16.msra.mxu3 %v913_v7  ;;  %v825_v51 = vor.u32 %v929_v46, %v822_v47  ;;  %v828_v54 = vld [vmem:[%s1131_s22 + $0x70] sm:$0xf]  ;;  %v932_v55 = vld [vmem:[%s1131_s22 + $0x74] sm:$0xf0]  ;;  %v923_v56 = vld [vmem:[%s1131_s22 + $0x34] sm:$0xf]  ;;  %v797_v60 = vor.u32 %v924_v53, %v796_v52 }
  0x1b   : > { %v798_v57 = vld [vmem:[%s1131_s22 + $0x38] sm:$0xf0]  ;;  %v931_v58 = vld [vmem:[%s1131_s22 + $0x74] sm:$0xf]  ;;  %v829_v61 = vor.u32 %v932_v55, %v828_v54  ;;  %v1177_v3 = vld [vmem:[%s1220_s2] ss:$0 sm:$0xff] }
  0x1c   : > { %v830_v59 = vld [vmem:[%s1131_s22 + $0x78] sm:$0xf0]  ;;  %v801_v62 = vor.u32 %v923_v56, %v798_v57 }
  0x1d   : > { %474 = vmatpush.bf16.msra.mxu0 %v904_v8  ;;  %984 = vmatpush.bf16.msra.mxu2 %v904_v8  ;;  %v833_v63 = vor.u32 %v931_v58, %v830_v59 }
  0x1e   : > { %523 = vmatpush.bf16.msra.mxu1 %v912_v9  ;;  %992 = vmatpush.bf16.msra.mxu3 %v912_v9 }
  0x21   : > { %475 = vmatpush.bf16.msra.mxu0 %v903_v10  ;;  %985 = vmatpush.bf16.msra.mxu2 %v903_v10 }
  0x22   : > { %524 = vmatpush.bf16.msra.mxu1 %v911_v11  ;;  %993 = vmatpush.bf16.msra.mxu3 %v911_v11 }
  0x25   : > { %476 = vmatpush.bf16.msra.mxu0 %v902_v12  ;;  %986 = vmatpush.bf16.msra.mxu2 %v902_v12 }
  0x26   : > { %525 = vmatpush.bf16.msra.mxu1 %v910_v13  ;;  %994 = vmatpush.bf16.msra.mxu3 %v910_v13 }
  0x29   : > { %477 = vmatpush.bf16.msra.mxu0 %v901_v14  ;;  %987 = vmatpush.bf16.msra.mxu2 %v901_v14 }
  0x2a   : > { %526 = vmatpush.bf16.msra.mxu1 %v909_v15  ;;  %995 = vmatpush.bf16.msra.mxu3 %v909_v15 }
  0x2c   : > { %478 = vmatmul.bf16.vlgmr.msra.gmra.mxu0 %v773_v24  ;;  %498 = vmatmul.bf16.vlgmr.msra.gmra.mxu2 %v805_v25 }
  0x2d   : > { %527 = vmatmul.bf16.vlgmr.msra.gmra.mxu1 %v777_v26  ;;  %547 = vmatmul.bf16.vlgmr.msra.gmra.mxu3 %v809_v27 }
  0x3c   : > { %483 = vmatmul.bf16.gmra.mxu0 %v781_v36  ;;  %503 = vmatmul.bf16.gmra.mxu2 %v813_v37 }
  0x3d   : > { %532 = vmatmul.bf16.gmra.mxu1 %v785_v38  ;;  %552 = vmatmul.bf16.gmra.mxu3 %v817_v39 }
  0x4c   : > { %488 = vmatmul.bf16.gmra.mxu0 %v789_v48  ;;  %508 = vmatmul.bf16.gmra.mxu2 %v821_v49 }
  0x4d   : > { %537 = vmatmul.bf16.gmra.mxu1 %v793_v50  ;;  %557 = vmatmul.bf16.gmra.mxu3 %v825_v51 }
  0x5c   : > { %493 = vmatmul.bf16.gmra.mxu0 %v797_v60  ;;  %513 = vmatmul.bf16.gmra.mxu2 %v829_v61 }
  0x5d   : > { %542 = vmatmul.bf16.gmra.mxu1 %v801_v62  ;;  %562 = vmatmul.bf16.gmra.mxu3 %v833_v63 }
  0xa9   : > { %v479_v0 = vpop.f32.mrf.mxu0 }
  0xaa   : > { %v528_v1 = vpop.f32.mrf.mxu1 }
  0xab   : > { %v529_v2 = vadd.f32 %v528_v1, %v479_v0 }
  0xad   : > { %v623_v8 = vadd.f32 %v1177_v3, %v529_v2 }
  0xaf   : > { %v499_v4 = vpop.f32.mrf.mxu2  ;;  %v639_v12 = vmax.f32 %v623_v8, 0.0 }
  0xb0   : > { %v548_v5 = vpop.f32.mrf.mxu3 }
  0xb1   : > { %v481_v6 = vpop.f32.mrf.mxu0  ;;  %v549_v10 = vadd.f32 %v548_v5, %v499_v4 }
  0xb2   : > { %v530_v7 = vpop.f32.mrf.mxu1 }
  0xb3   : > { %v531_v9 = vadd.f32 %v530_v7, %v481_v6  ;;  %v631_v16 = vadd.f32 %v1177_v3, %v549_v10 }
  0xb5   : > { %v624_v11 = vadd.f32 %v1177_v3, %v531_v9  ;;  %v647_v22 = vmax.f32 %v631_v16, 0.0 }
  0xb7   : > { %v640_v13 = vmax.f32 %v624_v11, 0.0  ;;  %v501_v14 = vpop.f32.mrf.mxu2 }
  0xb8   : > { %v550_v15 = vpop.f32.mrf.mxu3 }
  0xb9   : > { %v936_v17 = vpack.c.bf16 %v640_v13, %v639_v12  ;;  %v551_v18 = vadd.f32 %v550_v15, %v501_v14  ;;  %v484_v19 = vpop.f32.mrf.mxu0 }
  0xba   : > { %v533_v20 = vpop.f32.mrf.mxu1 }
  0xbb   : > { %937 = vst [vmem:[%s1185_s8] sm:$0xff] %v936_v17   ;;  %v632_v21 = vadd.f32 %v1177_v3, %v551_v18  ;;  %v534_v25 = vadd.f32 %v533_v20, %v484_v19 }
  0xbd   : > { %v648_v23 = vmax.f32 %v632_v21, 0.0  ;;  %v625_v30 = vadd.f32 %v1177_v3, %v534_v25 }
  0xbf   : > { %v956_v24 = vpack.c.bf16 %v648_v23, %v647_v22  ;;  %v504_v26 = vpop.f32.mrf.mxu2  ;;  %v641_v34 = vmax.f32 %v625_v30, 0.0 }
  0xc0   : > { %v553_v27 = vpop.f32.mrf.mxu3 }
  0xc1   : > { %976 = vst [vmem:[%s1185_s8 + $0x20] sm:$0xff] %v956_v24   ;;  %v486_v28 = vpop.f32.mrf.mxu0  ;;  %v554_v32 = vadd.f32 %v553_v27, %v504_v26 }
  0xc2   : > { %v535_v29 = vpop.f32.mrf.mxu1 }
  0xc3   : > { %v536_v31 = vadd.f32 %v535_v29, %v486_v28  ;;  %v633_v38 = vadd.f32 %v1177_v3, %v554_v32 }
  0xc5   : > { %v626_v33 = vadd.f32 %v1177_v3, %v536_v31  ;;  %v649_v44 = vmax.f32 %v633_v38, 0.0 }
  0xc7   : > { %v642_v35 = vmax.f32 %v626_v33, 0.0  ;;  %v506_v36 = vpop.f32.mrf.mxu2 }
  0xc8   : > { %v555_v37 = vpop.f32.mrf.mxu3 }
  0xc9   : > { %v941_v39 = vpack.c.bf16 %v642_v35, %v641_v34  ;;  %v556_v40 = vadd.f32 %v555_v37, %v506_v36  ;;  %v489_v41 = vpop.f32.mrf.mxu0 }
  0xca   : > { %v538_v42 = vpop.f32.mrf.mxu1 }
  0xcb   : > { %973 = vst [vmem:[%s1185_s8 + $0x8] sm:$0xff] %v941_v39   ;;  %v634_v43 = vadd.f32 %v1177_v3, %v556_v40  ;;  %v539_v47 = vadd.f32 %v538_v42, %v489_v41 }
  0xcd   : > { %v650_v45 = vmax.f32 %v634_v43, 0.0  ;;  %v627_v52 = vadd.f32 %v1177_v3, %v539_v47 }
  0xcf   : > { %v961_v46 = vpack.c.bf16 %v650_v45, %v649_v44  ;;  %v509_v48 = vpop.f32.mrf.mxu2  ;;  %v643_v56 = vmax.f32 %v627_v52, 0.0 }
  0xd0   : > { %v558_v49 = vpop.f32.mrf.mxu3 }
  0xd1   : > { %977 = vst [vmem:[%s1185_s8 + $0x28] sm:$0xff] %v961_v46   ;;  %v491_v50 = vpop.f32.mrf.mxu0  ;;  %v559_v54 = vadd.f32 %v558_v49, %v509_v48 }
  0xd2   : > { %v540_v51 = vpop.f32.mrf.mxu1 }
  0xd3   : > { %v541_v53 = vadd.f32 %v540_v51, %v491_v50  ;;  %v635_v60 = vadd.f32 %v1177_v3, %v559_v54 }
  0xd5   : > { %v628_v55 = vadd.f32 %v1177_v3, %v541_v53  ;;  %v651_v2 = vmax.f32 %v635_v60, 0.0 }
  0xd7   : > { %v644_v57 = vmax.f32 %v628_v55, 0.0  ;;  %v511_v58 = vpop.f32.mrf.mxu2 }
  0xd8   : > { %v560_v59 = vpop.f32.mrf.mxu3 }
  0xd9   : > { %v946_v61 = vpack.c.bf16 %v644_v57, %v643_v56  ;;  %v561_v62 = vadd.f32 %v560_v59, %v511_v58  ;;  %v494_v63 = vpop.f32.mrf.mxu0 }
  0xda   : > { %v543_v0 = vpop.f32.mrf.mxu1 }
  0xdb   : > { %974 = vst [vmem:[%s1185_s8 + $0x10] sm:$0xff] %v946_v61   ;;  %v636_v1 = vadd.f32 %v1177_v3, %v561_v62  ;;  %v544_v6 = vadd.f32 %v543_v0, %v494_v63 }
  0xdd   : > { %v652_v4 = vmax.f32 %v636_v1, 0.0  ;;  %v629_v11 = vadd.f32 %v1177_v3, %v544_v6 }
  0xdf   : > { %v966_v5 = vpack.c.bf16 %v652_v4, %v651_v2  ;;  %v514_v7 = vpop.f32.mrf.mxu2  ;;  %v645_v15 = vmax.f32 %v629_v11, 0.0 }
  0xe0   : > { %v563_v8 = vpop.f32.mrf.mxu3 }
  0xe1   : > { %978 = vst [vmem:[%s1185_s8 + $0x30] sm:$0xff] %v966_v5   ;;  %v496_v9 = vpop.f32.mrf.mxu0  ;;  %v564_v13 = vadd.f32 %v563_v8, %v514_v7 }
  0xe2   : > { %v545_v10 = vpop.f32.mrf.mxu1 }
  0xe3   : > { %v546_v12 = vadd.f32 %v545_v10, %v496_v9  ;;  %v637_v19 = vadd.f32 %v1177_v3, %v564_v13 }
  0xe5   : > { %v630_v14 = vadd.f32 %v1177_v3, %v546_v12  ;;  %v653_v23 = vmax.f32 %v637_v19, 0.0 }
  0xe7   : > { %v646_v16 = vmax.f32 %v630_v14, 0.0  ;;  %v516_v17 = vpop.f32.mrf.mxu2 }
  0xe8   : > { %v565_v18 = vpop.f32.mrf.mxu3 }
  0xe9   : > { %v951_v20 = vpack.c.bf16 %v646_v16, %v645_v15  ;;  %v566_v21 = vadd.f32 %v565_v18, %v516_v17 }
  0xeb   : > { %975 = vst [vmem:[%s1185_s8 + $0x18] sm:$0xff] %v951_v20   ;;  %v638_v22 = vadd.f32 %v1177_v3, %v566_v21 }
  0xed   : > { %v654_v24 = vmax.f32 %v638_v22, 0.0 }
  0xef   : > { %v971_v25 = vpack.c.bf16 %v654_v24, %v653_v23 }
  0xf1   : > { %979 = vst [vmem:[%s1185_s8 + $0x38] sm:$0xff] %v971_v25  }
  0xf2 PF: > { %s13_s14 = sadd.s32 1, %s1043_s14   ;;  %s1222_s12 = smov %s1039_s13 }
  0xf3   : > { %p10_p5 = scmp.ge.s32.totalorder %s13_s14, 4   ;;  %s1223_s13 = smov %s1225_s15 }
  0xf5   :  { %12 = sbr.rel (!%p10_p5) target bundleno = 2 (0x2), region = 71 }

</bundles_post_ra>
